<compile_context>
chip_gen: v6e
topology: v6e:2x2x1
jax: 0.10.0
libtpu: 0.0.40
codegen_flags: <defaults>
</compile_context>

<pallas_src>
import functools

import jax
import jax.numpy as jnp
from jax.experimental import pallas as pl
from jax.experimental.pallas import tpu as pltpu


# --------------------------------------------------------------------------
# Kernel
# --------------------------------------------------------------------------
def _gap_kernel(*refs, n_layers, fuse_hidden):
    """One grid step == Bt graphs.  All MLP weights resident in VMEM (bf16)."""
    feat_ref, w0_ref, b0_ref = refs[0], refs[1], refs[2]
    gate_wo_ref, gate_bo_ref, out_ref = refs[-3], refs[-2], refs[-1]

    bt, n, d = feat_ref.shape
    m_rows = bt * n

    # Flatten graphs into one big matmul M-dim: (Bt, N, D) -> (Bt*N, D), bf16.
    x = feat_ref[...].reshape(m_rows, d)

    # ---- fused layer 0: gate_nn and feat_nn share the input x ----
    # w0 = concat([gate_w[0], feat_w[0]], axis=-1) -> (D, 2D) bf16 operands,
    # f32 accumulation; bias + ReLU in f32.  Result a = [h | g]  (M, 2D) f32.
    a = jnp.dot(x, w0_ref[...], preferred_element_type=jnp.float32)
    a = jnp.maximum(a + b0_ref[...], 0.0)

    # ---- remaining hidden layers (Linear(D,D) + ReLU per branch) ----
    # NOTE: static Python unroll is fine for small n_layers; for deep MLPs
    # (n_layers >= ~4) switch to lax.fori_loop(..., unroll=True) with dynamic
    # wh_ref[i] indexing so live ranges stay bounded.
    if n_layers > 1:
        if fuse_hidden:
            # Block-diagonal (2D, 2D) weight: one K=N=2D matmul fills a
            # 256x256 MXU, and keeps a single fused [h|g] activation alive.
            wh_ref, bh_ref = refs[3], refs[4]
            for i in range(n_layers - 1):
                a_bf = a.astype(jnp.bfloat16)          # single cast per layer
                z = jnp.dot(a_bf, wh_ref[i], preferred_element_type=jnp.float32)
                a = jnp.maximum(z + bh_ref[i][None, :], 0.0)
            h = a[:, :d]            # gate_nn branch (f32, final layer)
            g = a[:, d:]            # feat_nn branch (f32, final layer)
        else:
            # v5e path: two (M,128)@(128,128) matmuls already fill its MXU.
            gw_ref, gb_ref, fw_ref, fb_ref = refs[3], refs[4], refs[5], refs[6]
            h, g = a[:, :d], a[:, d:]
            for i in range(n_layers - 1):
                h_bf = h.astype(jnp.bfloat16)
                g_bf = g.astype(jnp.bfloat16)
                h = jnp.maximum(
                    jnp.dot(h_bf, gw_ref[i], preferred_element_type=jnp.float32)
                    + gb_ref[i][None, :], 0.0)
                g = jnp.maximum(
                    jnp.dot(g_bf, fw_ref[i], preferred_element_type=jnp.float32)
                    + fb_ref[i][None, :], 0.0)
    else:
        h, g = a[:, :d], a[:, d:]

    # ---- back to per-graph layout for segment softmax / weighted sum ----
    h3 = h.reshape(bt, n, d)
    g3 = g.reshape(bt, n, d)

    # gate_nn final Linear(D, 1) as a lane reduction: (Bt, N, 1) logits.
    logits = jnp.sum(h3 * gate_wo_ref[...], axis=-1, keepdims=True)
    logits = logits + gate_bo_ref[0, 0]                      # SMEM scalar

    # Softmax over the nodes of each graph (stable; approx recip on the EUP).
    # NOTE: for large N (hundreds+) compute logits in a (Bt, N) lane-major
    # layout and do the weighted sum as einsum('bn,bnd->bd') on the MXU; at
    # small N the sublane reductions below are negligible.
    mx = jnp.max(logits, axis=1, keepdims=True)              # (Bt, 1, 1)
    e = jnp.exp(logits - mx)                                 # (Bt, N, 1)
    attn = e * pl.reciprocal(jnp.sum(e, axis=1, keepdims=True), approx=True)

    # Attention-weighted sum over nodes -> (Bt, D), lane-dense store.
    out_ref[...] = jnp.sum(g3 * attn, axis=1).astype(out_ref.dtype)


# --------------------------------------------------------------------------
# Tile sizing (real VMEM residency model) and hardware detection
# --------------------------------------------------------------------------
def _device_kind():
    try:
        return jax.devices()[0].device_kind.lower()
    except Exception:
        return ""


def _is_256_mxu(kind):
    # v6e / v7x have a 256x256 MXU; v2..v5 parts have 128x128.
    return not any(tag in kind for tag in ("v2", "v3", "v4", "v5"))


def _is_v7x(kind):
    return ("v7" in kind) or ("tpu7" in kind)


def _vmem_limit_bytes(kind):
    # v7x has 64 MiB physical VMEM per TensorCore; v5e/v6e have 128 MiB.
    return (48 << 20) if _is_v7x(kind) else (96 << 20)


def _num_tensorcores(kind):
    return 2 if _is_v7x(kind) else 1


def _residency_bytes(bt, n, d, n_hidden, fuse_hidden):
    """Approximate peak VMEM residency for one grid step (bytes).

    Counts: double-buffered feat (bf16) and out (f32) blocks, double-buffered
    resident weights, plus live in-body intermediates (f32 accumulator, f32
    activation, bf16 activation copy, bf16 input copy, weighted-sum temp)."""
    m = bt * n
    d2 = 2 * d
    feat_io = 2 * m * d * 2                       # bf16 feat tile, x2 buffers
    out_io = 2 * bt * d * 4                       # f32 output tile, x2 buffers
    w_layer0 = d * d2 * 2 + d2 * 4                # fused (D,2D) bf16 + f32 bias
    if fuse_hidden:
        w_hidden = n_hidden * (d2 * d2 * 2 + d2 * 4)
    else:
        w_hidden = n_hidden * 2 * (d * d * 2 + d * 4)
    weights = 2 * (w_layer0 + w_hidden + d * 4)   # x2: default double-buffered
    inter = m * (d2 * 4 + d2 * 4 + d2 * 2 + d * 2 + d * 4)
    return feat_io + out_io + weights + inter


def _choose_block_graphs(B, n, d, n_hidden, fuse_hidden, vmem_budget,
                         want_multi_step):
    """Largest legal graph tile (multiple-of-8 divisor of B, or B itself) whose
    modeled residency fits the budget; on 2-core parts prefer Bt <= B/2 so the
    parallel grid axis has >= 2 steps."""
    cands = sorted({bt for bt in range(8, B + 1, 8) if B % bt == 0} | {B})
    fitting = [bt for bt in cands
               if _residency_bytes(bt, n, d, n_hidden, fuse_hidden) <= vmem_budget]
    if not fitting:
        return cands[0]     # smallest legal tile; vmem_limit is raised anyway
    if want_multi_step:
        multi = [bt for bt in fitting if B // bt >= 2]
        if multi:
            return max(multi)
    return max(fitting)


# --------------------------------------------------------------------------
# Wrapper
# --------------------------------------------------------------------------
def global_attention_pooling(feat, gate_w, gate_b, gate_wo, gate_bo,
                             feat_w, feat_b, *, block_graphs=None,
                             fuse_hidden=None):
    """feat: (B, N, D).  Returns (B, D) f32 graph readouts."""
    B, N, D = feat.shape
    L = gate_w.shape[0]
    assert L >= 1, "need at least one hidden layer"
    assert N % 16 == 0, "node count must be a multiple of 16 (bf16 sublane tiling)"
    assert D % 128 == 0, "hidden_dim must be a multiple of 128 (lane tiling)"

    kind = _device_kind()
    if fuse_hidden is None:
        fuse_hidden = _is_256_mxu(kind)        # block-diag fusion on v6e/v7x only
    vmem_limit = _vmem_limit_bytes(kind)
    want_multi = (_num_tensorcores(kind) > 1) and (B >= 16)

    n_hidden = L - 1
    if block_graphs is None:
        Bt = _choose_block_graphs(B, N, D, n_hidden, fuse_hidden,
                                  (vmem_limit * 3) // 4, want_multi)
    else:
        Bt = block_graphs
    assert B % Bt == 0 and (Bt == B or Bt % 8 == 0)

    # feat is the only per-step streamed tensor -> stream it in bf16 (the
    # kernel consumes bf16 MXU operands anyway; halves HBM bytes + VMEM tile).
    feat = feat.astype(jnp.bfloat16)

    # --- weight prep: layer-0 fusion + bf16 matmul operands (f32 biases) ---
    w0 = jnp.concatenate([gate_w[0], feat_w[0]], axis=-1).astype(jnp.bfloat16)   # (D, 2D)
    b0 = jnp.concatenate([gate_b[0], feat_b[0]], axis=-1)[None, :].astype(jnp.float32)
    gate_wo_r = gate_wo.reshape(1, D).astype(jnp.float32)
    gate_bo_r = gate_bo.reshape(1, 1).astype(jnp.float32)

    hidden_inputs = []
    if L > 1:
        if fuse_hidden:
            # Block-diagonal (2D, 2D) per hidden layer: [[gate_w, 0], [0, feat_w]].
            zeros = jnp.zeros((L - 1, D, D), gate_w.dtype)
            wh = jnp.concatenate(
                [jnp.concatenate([gate_w[1:], zeros], axis=-1),
                 jnp.concatenate([zeros, feat_w[1:]], axis=-1)],
                axis=1).astype(jnp.bfloat16)                                   # (Lr, 2D, 2D)
            bh = jnp.concatenate([gate_b[1:], feat_b[1:]], axis=-1).astype(jnp.float32)
            hidden_inputs = [wh, bh]

            def _hidden_specs(kw):
                return [pl.BlockSpec((L - 1, 2 * D, 2 * D), lambda b: (0, 0, 0), **kw),
                        pl.BlockSpec((L - 1, 2 * D), lambda b: (0, 0), **kw)]
        else:
            gw = gate_w[1:].astype(jnp.bfloat16)
            gb = gate_b[1:].astype(jnp.float32)
            fw = feat_w[1:].astype(jnp.bfloat16)
            fb = feat_b[1:].astype(jnp.float32)
            hidden_inputs = [gw, gb, fw, fb]

            def _hidden_specs(kw):
                return [pl.BlockSpec((L - 1, D, D), lambda b: (0, 0, 0), **kw),
                        pl.BlockSpec((L - 1, D), lambda b: (0, 0), **kw),
                        pl.BlockSpec((L - 1, D, D), lambda b: (0, 0, 0), **kw),
                        pl.BlockSpec((L - 1, D), lambda b: (0, 0), **kw)]
    else:
        # L == 1 specialization: no dummy hidden-weight tensors are DMA'd.
        def _hidden_specs(kw):
            return []

    inputs = [feat, w0, b0, *hidden_inputs, gate_wo_r, gate_bo_r]
    kernel = functools.partial(_gap_kernel, n_layers=L, fuse_hidden=fuse_hidden)

    def _build_call(single_buffer_weights):
        # Constant-index weight blocks don't need double buffering.
        kw = {"pipeline_mode": pl.Buffered(1)} if single_buffer_weights else {}
        in_specs = [
            pl.BlockSpec((Bt, N, D), lambda b: (b, 0, 0)),          # feat tile
            pl.BlockSpec((D, 2 * D), lambda b: (0, 0), **kw),       # fused layer-0 W
            pl.BlockSpec((1, 2 * D), lambda b: (0, 0), **kw),       # fused layer-0 b
            *_hidden_specs(kw),                                     # hidden weights
            pl.BlockSpec((1, D), lambda b: (0, 0), **kw),           # gate output W (row)
            pl.BlockSpec(memory_space=pltpu.MemorySpace.SMEM),      # gate output b (scalar)
        ]
        return pl.pallas_call(
            kernel,
            out_shape=jax.ShapeDtypeStruct((B, D), jnp.float32),
            grid_spec=pltpu.PrefetchScalarGridSpec(
                num_scalar_prefetch=0,
                grid=(B // Bt,),
                in_specs=in_specs,
                out_specs=pl.BlockSpec((Bt, D), lambda b: (b, 0)),
            ),
            compiler_params=pltpu.CompilerParams(
                dimension_semantics=("parallel",),
                vmem_limit_bytes=vmem_limit),
        )

    try:
        return _build_call(True)(*inputs)
    except Exception:
        # This Mosaic/JAX build rejected pipeline_mode=pl.Buffered(1);
        # fall back to default double-buffered weight blocks.
        return _build_call(False)(*inputs)


# --------------------------------------------------------------------------
# Pure-JAX reference (mirrors the PyTorch/DGL forward)
# --------------------------------------------------------------------------
def _reference(feat, gate_w, gate_b, gate_wo, gate_bo, feat_w, feat_b,
               *, matmul_dtype=jnp.float32):
    """matmul_dtype=bfloat16 mirrors the kernel's MXU operand precision."""
    h = feat
    for i in range(gate_w.shape[0]):
        h = jnp.maximum(
            jnp.einsum('bnd,dk->bnk', h.astype(matmul_dtype),
                       gate_w[i].astype(matmul_dtype),
                       preferred_element_type=jnp.float32) + gate_b[i], 0.0)
    gate = jnp.sum(h * gate_wo[0], axis=-1, keepdims=True) + gate_bo[0, 0]  # (B,N,1)
    g = feat
    for i in range(feat_w.shape[0]):
        g = jnp.maximum(
            jnp.einsum('bnd,dk->bnk', g.astype(matmul_dtype),
                       feat_w[i].astype(matmul_dtype),
                       preferred_element_type=jnp.float32) + feat_b[i], 0.0)
    attn = jax.nn.softmax(gate, axis=1)                                     # over nodes
    return jnp.sum(g * attn, axis=1)                                        # (B, D)


if __name__ == "__main__":
    # Module hyperparameters (deterministic synthetic init, ReLU activation).
    hidden_dim, n_layers = 128, 2
    B, N, D = 2, 16, hidden_dim

    key = jax.random.PRNGKey(0)
    ks = jax.random.split(key, 7)
    scale = 1.0 / jnp.sqrt(jnp.float32(D))

    # Weights stored as (in, out) so kernel computes x @ W + b
    # (equivalent to PyTorch nn.Linear's x @ W.T + b with W := W_t.T).
    feat_in = jax.random.normal(ks[0], (B, N, D), jnp.float32)
    gate_w  = jax.random.normal(ks[1], (n_layers, D, D), jnp.float32) * scale
    gate_b  = jax.random.normal(ks[2], (n_layers, D), jnp.float32) * 0.1
    gate_wo = jax.random.normal(ks[3], (1, D), jnp.float32) * scale
    gate_bo = jax.random.normal(ks[4], (1, 1), jnp.float32) * 0.1
    feat_w  = jax.random.normal(ks[5], (n_layers, D, D), jnp.float32) * scale
    feat_b  = jax.random.normal(ks[6], (n_layers, D), jnp.float32) * 0.1

    out = global_attention_pooling(feat_in, gate_w, gate_b, gate_wo, gate_bo,
                                   feat_w, feat_b)
    out = jax.block_until_ready(out)
    assert out.shape == (B, D)

    # Primary check: reference with the same bf16-operand / f32-accumulate math.
    ref_bf16 = _reference(feat_in, gate_w, gate_b, gate_wo, gate_bo,
                          feat_w, feat_b, matmul_dtype=jnp.bfloat16)
    assert jnp.allclose(out, ref_bf16, atol=2e-3, rtol=2e-3), \
        "mismatch vs bf16-matmul reference"

    # Sanity check: full-f32 semantics (loose tolerance for bf16 MXU operands).
    ref_f32 = _reference(feat_in, gate_w, gate_b, gate_wo, gate_bo,
                         feat_w, feat_b, matmul_dtype=jnp.float32)
    assert jnp.allclose(out, ref_f32, atol=1e-1, rtol=1e-1), \
        "mismatch vs f32 reference"

    print("KERNEL_OK")
</pallas_src>

<mosaic_0001>
module attributes {stable_mosaic.version = 11 : i64} {
  func.func @_gap_kernel(%arg0: i32, %arg1: memref<2x16x128xbf16, #tpu.memory_space<vmem>>, %arg2: memref<128x256xbf16, #tpu.memory_space<vmem>>, %arg3: memref<1x256xf32, #tpu.memory_space<vmem>>, %arg4: memref<1x256x256xbf16, #tpu.memory_space<vmem>>, %arg5: memref<1x256xf32, #tpu.memory_space<vmem>>, %arg6: memref<1x128xf32, #tpu.memory_space<vmem>>, %arg7: memref<1x1xf32, #tpu.memory_space<smem>>, %arg8: memref<2x128xf32, #tpu.memory_space<vmem>>) attributes {dimension_semantics = [#tpu.dimension_semantics<parallel>], iteration_bounds = array<i64: 1>, scalar_prefetch = 0 : i64, scratch_operands = 0 : i64, tpu.core_type = #tpu.core_type<tc>, window_params = [{transform_indices = @transform_0, window_bounds = array<i64: 2, 16, 128>}, {pipeline_mode = #tpu.pipeline_mode<synchronous>, transform_indices = @transform_1, window_bounds = array<i64: 128, 256>}, {pipeline_mode = #tpu.pipeline_mode<synchronous>, transform_indices = @transform_2, window_bounds = array<i64: 1, 256>}, {pipeline_mode = #tpu.pipeline_mode<synchronous>, transform_indices = @transform_3, window_bounds = array<i64: 1, 256, 256>}, {pipeline_mode = #tpu.pipeline_mode<synchronous>, transform_indices = @transform_4, window_bounds = array<i64: 1, 256>}, {pipeline_mode = #tpu.pipeline_mode<synchronous>, transform_indices = @transform_5, window_bounds = array<i64: 1, 128>}, {transform_indices = @transform_6, window_bounds = array<i64: 1, 1>}, {transform_indices = @transform_7, window_bounds = array<i64: 2, 128>}]} {
    %c0 = arith.constant 0 : index
    %c0_0 = arith.constant 0 : index
    %c0_1 = arith.constant 0 : index
    %0 = vector.load %arg1[%c0, %c0_0, %c0_1] : memref<2x16x128xbf16, #tpu.memory_space<vmem>>, vector<2x16x128xbf16>
    %1 = vector.shape_cast %0 : vector<2x16x128xbf16> to vector<32x128xbf16>
    %c0_2 = arith.constant 0 : index
    %c0_3 = arith.constant 0 : index
    %2 = vector.load %arg2[%c0_2, %c0_3] : memref<128x256xbf16, #tpu.memory_space<vmem>>, vector<128x256xbf16>
    %cst = arith.constant dense<0.000000e+00> : vector<32x256xf32>
    %3 = tpu.matmul %1, %2, %cst {dimension_numbers = #tpu.dot_dimension_numbers<[1], [0], [0], [1], [0, 0, 1, 1], [], []>} : vector<32x128xbf16>, vector<128x256xbf16>, vector<32x256xf32> -> vector<32x256xf32>
    %c0_4 = arith.constant 0 : index
    %c0_5 = arith.constant 0 : index
    %4 = vector.load %arg3[%c0_4, %c0_5] : memref<1x256xf32, #tpu.memory_space<vmem>>, vector<1x256xf32>
    %5 = vector.broadcast %4 : vector<1x256xf32> to vector<32x256xf32>
    %6 = arith.addf %3, %5 : vector<32x256xf32>
    %cst_6 = arith.constant 0.000000e+00 : f32
    %7 = vector.broadcast %cst_6 : f32 to vector<32x256xf32>
    %8 = arith.maximumf %6, %7 : vector<32x256xf32>
    %9 = arith.truncf %8 : vector<32x256xf32> to vector<32x256xbf16>
    %c0_7 = arith.constant 0 : index
    %c0_8 = arith.constant 0 : index
    %c0_9 = arith.constant 0 : index
    %10 = vector.load %arg4[%c0_7, %c0_8, %c0_9] : memref<1x256x256xbf16, #tpu.memory_space<vmem>>, vector<1x256x256xbf16>
    %11 = vector.shape_cast %10 : vector<1x256x256xbf16> to vector<256x256xbf16>
    %cst_10 = arith.constant dense<0.000000e+00> : vector<32x256xf32>
    %12 = tpu.matmul %9, %11, %cst_10 {dimension_numbers = #tpu.dot_dimension_numbers<[1], [0], [0], [1], [0, 0, 1, 1], [], []>} : vector<32x256xbf16>, vector<256x256xbf16>, vector<32x256xf32> -> vector<32x256xf32>
    %c0_11 = arith.constant 0 : index
    %c0_12 = arith.constant 0 : index
    %13 = vector.load %arg5[%c0_11, %c0_12] : memref<1x256xf32, #tpu.memory_space<vmem>>, vector<1x256xf32>
    %14 = vector.shape_cast %13 : vector<1x256xf32> to vector<256xf32>
    %15 = vector.shape_cast %14 : vector<256xf32> to vector<1x256xf32>
    %16 = vector.broadcast %15 : vector<1x256xf32> to vector<32x256xf32>
    %17 = arith.addf %12, %16 : vector<32x256xf32>
    %cst_13 = arith.constant 0.000000e+00 : f32
    %18 = vector.broadcast %cst_13 : f32 to vector<32x256xf32>
    %19 = arith.maximumf %17, %18 : vector<32x256xf32>
    %20 = vector.extract_strided_slice %19 {offsets = [0, 0], sizes = [32, 128], strides = [1, 1]} : vector<32x256xf32> to vector<32x128xf32>
    %21 = vector.extract_strided_slice %19 {offsets = [0, 128], sizes = [32, 128], strides = [1, 1]} : vector<32x256xf32> to vector<32x128xf32>
    %22 = vector.shape_cast %20 : vector<32x128xf32> to vector<2x16x128xf32>
    %23 = vector.shape_cast %21 : vector<32x128xf32> to vector<2x16x128xf32>
    %c0_14 = arith.constant 0 : index
    %c0_15 = arith.constant 0 : index
    %24 = vector.load %arg6[%c0_14, %c0_15] : memref<1x128xf32, #tpu.memory_space<vmem>>, vector<1x128xf32>
    %25 = vector.shape_cast %24 : vector<1x128xf32> to vector<1x1x128xf32>
    %26 = vector.broadcast %25 : vector<1x1x128xf32> to vector<2x16x128xf32>
    %27 = arith.mulf %22, %26 : vector<2x16x128xf32>
    %cst_16 = arith.constant dense<0.000000e+00> : vector<2x16xf32>
    %28 = vector.multi_reduction <add>, %27, %cst_16 [2] : vector<2x16x128xf32> to vector<2x16xf32>
    %29 = vector.shape_cast %28 : vector<2x16xf32> to vector<2x16x1xf32>
    %c0_17 = arith.constant 0 : index
    %c0_18 = arith.constant 0 : index
    %30 = memref.load %arg7[%c0_17, %c0_18] : memref<1x1xf32, #tpu.memory_space<smem>>
    %31 = vector.broadcast %30 : f32 to vector<2x16x1xf32>
    %32 = arith.addf %29, %31 : vector<2x16x1xf32>
    %cst_19 = arith.constant dense<0xFF800000> : vector<2x1xf32>
    %33 = vector.multi_reduction <maximumf>, %32, %cst_19 [1] : vector<2x16x1xf32> to vector<2x1xf32>
    %34 = vector.shape_cast %33 : vector<2x1xf32> to vector<2x1x1xf32>
    %35 = vector.broadcast %34 : vector<2x1x1xf32> to vector<2x16x1xf32>
    %36 = arith.subf %32, %35 : vector<2x16x1xf32>
    %37 = math.exp %36 : vector<2x16x1xf32>
    %cst_20 = arith.constant dense<0.000000e+00> : vector<2x1xf32>
    %38 = vector.multi_reduction <add>, %37, %cst_20 [1] : vector<2x16x1xf32> to vector<2x1xf32>
    %39 = vector.shape_cast %38 : vector<2x1xf32> to vector<2x1x1xf32>
    %40 = tpu.reciprocal %39 {approx = true} : vector<2x1x1xf32> -> vector<2x1x1xf32>
    %41 = vector.broadcast %40 : vector<2x1x1xf32> to vector<2x16x1xf32>
    %42 = arith.mulf %37, %41 : vector<2x16x1xf32>
    %43 = vector.broadcast %42 : vector<2x16x1xf32> to vector<2x16x128xf32>
    %44 = arith.mulf %23, %43 : vector<2x16x128xf32>
    %cst_21 = arith.constant dense<0.000000e+00> : vector<2x128xf32>
    %45 = vector.multi_reduction <add>, %44, %cst_21 [1] : vector<2x16x128xf32> to vector<2x128xf32>
    %c0_22 = arith.constant 0 : index
    %c0_23 = arith.constant 0 : index
    %46 = vector.load %arg8[%c0_22, %c0_23] : memref<2x128xf32, #tpu.memory_space<vmem>>, vector<2x128xf32>
    tpu.vector_store %arg8[%c0_22, %c0_23], %45 {strides = array<i32>} : memref<2x128xf32, #tpu.memory_space<vmem>>, vector<2x128xf32>,
    return
  }
  func.func @transform_0(%arg0: i32) -> (i32, i32, i32) {
    %c0_i32 = arith.constant 0 : i32
    %c0_i32_0 = arith.constant 0 : i32
    %c0_i32_1 = arith.constant 0 : i32
    return %arg0, %c0_i32, %c0_i32_0 : i32, i32, i32
  }
  func.func @transform_1(%arg0: i32) -> (i32, i32) {
    %c0_i32 = arith.constant 0 : i32
    %c0_i32_0 = arith.constant 0 : i32
    %c0_i32_1 = arith.constant 0 : i32
    return %c0_i32, %c0_i32_0 : i32, i32
  }
  func.func @transform_2(%arg0: i32) -> (i32, i32) {
    %c0_i32 = arith.constant 0 : i32
    %c0_i32_0 = arith.constant 0 : i32
    %c0_i32_1 = arith.constant 0 : i32
    return %c0_i32, %c0_i32_0 : i32, i32
  }
  func.func @transform_3(%arg0: i32) -> (i32, i32, i32) {
    %c0_i32 = arith.constant 0 : i32
    %c0_i32_0 = arith.constant 0 : i32
    %c0_i32_1 = arith.constant 0 : i32
    %c0_i32_2 = arith.constant 0 : i32
    return %c0_i32, %c0_i32_0, %c0_i32_1 : i32, i32, i32
  }
  func.func @transform_4(%arg0: i32) -> (i32, i32) {
    %c0_i32 = arith.constant 0 : i32
    %c0_i32_0 = arith.constant 0 : i32
    %c0_i32_1 = arith.constant 0 : i32
    return %c0_i32, %c0_i32_0 : i32, i32
  }
  func.func @transform_5(%arg0: i32) -> (i32, i32) {
    %c0_i32 = arith.constant 0 : i32
    %c0_i32_0 = arith.constant 0 : i32
    %c0_i32_1 = arith.constant 0 : i32
    return %c0_i32, %c0_i32_0 : i32, i32
  }
  func.func @transform_6(%arg0: i32) -> (i32, i32) {
    %c0_i32 = arith.constant 0 : i32
    %c0_i32_0 = arith.constant 0 : i32
    %c0_i32_1 = arith.constant 0 : i32
    return %c0_i32, %c0_i32_0 : i32, i32
  }
  func.func @transform_7(%arg0: i32) -> (i32, i32) {
    %c0_i32 = arith.constant 0 : i32
    %c0_i32_0 = arith.constant 0 : i32
    return %arg0, %c0_i32 : i32, i32
  }
}

module attributes {stable_mosaic.version = 11 : i64} {
  func.func @_gap_kernel(%arg0: i32, %arg1: memref<2x16x128xbf16, #tpu.memory_space<vmem>>, %arg2: memref<128x256xbf16, #tpu.memory_space<vmem>>, %arg3: memref<1x256xf32, #tpu.memory_space<vmem>>, %arg4: memref<1x256x256xbf16, #tpu.memory_space<vmem>>, %arg5: memref<1x256xf32, #tpu.memory_space<vmem>>, %arg6: memref<1x128xf32, #tpu.memory_space<vmem>>, %arg7: memref<1x1xf32, #tpu.memory_space<smem>>, %arg8: memref<2x128xf32, #tpu.memory_space<vmem>>) attributes {dimension_semantics = [#tpu.dimension_semantics<parallel>], iteration_bounds = array<i64: 1>, scalar_prefetch = 0 : i64, scratch_operands = 0 : i64, tpu.core_type = #tpu.core_type<tc>, window_params = [{transform_indices = @transform_0, window_bounds = array<i64: 2, 16, 128>}, {pipeline_mode = #tpu.pipeline_mode<synchronous>, transform_indices = @transform_1, window_bounds = array<i64: 128, 256>}, {pipeline_mode = #tpu.pipeline_mode<synchronous>, transform_indices = @transform_2, window_bounds = array<i64: 1, 256>}, {pipeline_mode = #tpu.pipeline_mode<synchronous>, transform_indices = @transform_3, window_bounds = array<i64: 1, 256, 256>}, {pipeline_mode = #tpu.pipeline_mode<synchronous>, transform_indices = @transform_4, window_bounds = array<i64: 1, 256>}, {pipeline_mode = #tpu.pipeline_mode<synchronous>, transform_indices = @transform_5, window_bounds = array<i64: 1, 128>}, {transform_indices = @transform_6, window_bounds = array<i64: 1, 1>}, {transform_indices = @transform_7, window_bounds = array<i64: 2, 128>}]} {
    %c0 = arith.constant 0 : index
    %c0_0 = arith.constant 0 : index
    %c0_1 = arith.constant 0 : index
    %0 = vector.load %arg1[%c0, %c0_0, %c0_1] : memref<2x16x128xbf16, #tpu.memory_space<vmem>>, vector<2x16x128xbf16>
    %1 = vector.shape_cast %0 : vector<2x16x128xbf16> to vector<32x128xbf16>
    %c0_2 = arith.constant 0 : index
    %c0_3 = arith.constant 0 : index
    %2 = vector.load %arg2[%c0_2, %c0_3] : memref<128x256xbf16, #tpu.memory_space<vmem>>, vector<128x256xbf16>
    %cst = arith.constant dense<0.000000e+00> : vector<32x256xf32>
    %3 = tpu.matmul %1, %2, %cst {dimension_numbers = #tpu.dot_dimension_numbers<[1], [0], [0], [1], [0, 0, 1, 1], [], []>} : vector<32x128xbf16>, vector<128x256xbf16>, vector<32x256xf32> -> vector<32x256xf32>
    %c0_4 = arith.constant 0 : index
    %c0_5 = arith.constant 0 : index
    %4 = vector.load %arg3[%c0_4, %c0_5] : memref<1x256xf32, #tpu.memory_space<vmem>>, vector<1x256xf32>
    %5 = vector.broadcast %4 : vector<1x256xf32> to vector<32x256xf32>
    %6 = arith.addf %3, %5 : vector<32x256xf32>
    %cst_6 = arith.constant 0.000000e+00 : f32
    %7 = vector.broadcast %cst_6 : f32 to vector<32x256xf32>
    %8 = arith.maximumf %6, %7 : vector<32x256xf32>
    %9 = arith.truncf %8 : vector<32x256xf32> to vector<32x256xbf16>
    %c0_7 = arith.constant 0 : index
    %c0_8 = arith.constant 0 : index
    %c0_9 = arith.constant 0 : index
    %10 = vector.load %arg4[%c0_7, %c0_8, %c0_9] : memref<1x256x256xbf16, #tpu.memory_space<vmem>>, vector<1x256x256xbf16>
    %11 = vector.shape_cast %10 : vector<1x256x256xbf16> to vector<256x256xbf16>
    %cst_10 = arith.constant dense<0.000000e+00> : vector<32x256xf32>
    %12 = tpu.matmul %9, %11, %cst_10 {dimension_numbers = #tpu.dot_dimension_numbers<[1], [0], [0], [1], [0, 0, 1, 1], [], []>} : vector<32x256xbf16>, vector<256x256xbf16>, vector<32x256xf32> -> vector<32x256xf32>
    %c0_11 = arith.constant 0 : index
    %c0_12 = arith.constant 0 : index
    %13 = vector.load %arg5[%c0_11, %c0_12] : memref<1x256xf32, #tpu.memory_space<vmem>>, vector<1x256xf32>
    %14 = vector.shape_cast %13 : vector<1x256xf32> to vector<256xf32>
    %15 = vector.shape_cast %14 : vector<256xf32> to vector<1x256xf32>
    %16 = vector.broadcast %15 : vector<1x256xf32> to vector<32x256xf32>
    %17 = arith.addf %12, %16 : vector<32x256xf32>
    %cst_13 = arith.constant 0.000000e+00 : f32
    %18 = vector.broadcast %cst_13 : f32 to vector<32x256xf32>
    %19 = arith.maximumf %17, %18 : vector<32x256xf32>
    %20 = vector.extract_strided_slice %19 {offsets = [0, 0], sizes = [32, 128], strides = [1, 1]} : vector<32x256xf32> to vector<32x128xf32>
    %21 = vector.extract_strided_slice %19 {offsets = [0, 128], sizes = [32, 128], strides = [1, 1]} : vector<32x256xf32> to vector<32x128xf32>
    %22 = vector.shape_cast %20 : vector<32x128xf32> to vector<2x16x128xf32>
    %23 = vector.shape_cast %21 : vector<32x128xf32> to vector<2x16x128xf32>
    %c0_14 = arith.constant 0 : index
    %c0_15 = arith.constant 0 : index
    %24 = vector.load %arg6[%c0_14, %c0_15] : memref<1x128xf32, #tpu.memory_space<vmem>>, vector<1x128xf32>
    %25 = vector.shape_cast %24 : vector<1x128xf32> to vector<1x1x128xf32>
    %26 = vector.broadcast %25 : vector<1x1x128xf32> to vector<2x16x128xf32>
    %27 = arith.mulf %22, %26 : vector<2x16x128xf32>
    %cst_16 = arith.constant dense<0.000000e+00> : vector<2x16xf32>
    %28 = vector.multi_reduction <add>, %27, %cst_16 [2] : vector<2x16x128xf32> to vector<2x16xf32>
    %29 = vector.shape_cast %28 : vector<2x16xf32> to vector<2x16x1xf32>
    %c0_17 = arith.constant 0 : index
    %c0_18 = arith.constant 0 : index
    %30 = memref.load %arg7[%c0_17, %c0_18] : memref<1x1xf32, #tpu.memory_space<smem>>
    %31 = vector.broadcast %30 : f32 to vector<2x16x1xf32>
    %32 = arith.addf %29, %31 : vector<2x16x1xf32>
    %cst_19 = arith.constant dense<0xFF800000> : vector<2x1xf32>
    %33 = vector.multi_reduction <maximumf>, %32, %cst_19 [1] : vector<2x16x1xf32> to vector<2x1xf32>
    %34 = vector.shape_cast %33 : vector<2x1xf32> to vector<2x1x1xf32>
    %35 = vector.broadcast %34 : vector<2x1x1xf32> to vector<2x16x1xf32>
    %36 = arith.subf %32, %35 : vector<2x16x1xf32>
    %37 = math.exp %36 : vector<2x16x1xf32>
    %cst_20 = arith.constant dense<0.000000e+00> : vector<2x1xf32>
    %38 = vector.multi_reduction <add>, %37, %cst_20 [1] : vector<2x16x1xf32> to vector<2x1xf32>
    %39 = vector.shape_cast %38 : vector<2x1xf32> to vector<2x1x1xf32>
    %40 = tpu.reciprocal %39 {approx = true} : vector<2x1x1xf32> -> vector<2x1x1xf32>
    %41 = vector.broadcast %40 : vector<2x1x1xf32> to vector<2x16x1xf32>
    %42 = arith.mulf %37, %41 : vector<2x16x1xf32>
    %43 = vector.broadcast %42 : vector<2x16x1xf32> to vector<2x16x128xf32>
    %44 = arith.mulf %23, %43 : vector<2x16x128xf32>
    %cst_21 = arith.constant dense<0.000000e+00> : vector<2x128xf32>
    %45 = vector.multi_reduction <add>, %44, %cst_21 [1] : vector<2x16x128xf32> to vector<2x128xf32>
    %c0_22 = arith.constant 0 : index
    %c0_23 = arith.constant 0 : index
    %46 = vector.load %arg8[%c0_22, %c0_23] : memref<2x128xf32, #tpu.memory_space<vmem>>, vector<2x128xf32>
    tpu.vector_store %arg8[%c0_22, %c0_23], %45 {strides = array<i32>} : memref<2x128xf32, #tpu.memory_space<vmem>>, vector<2x128xf32>,
    return
  }
  func.func @transform_0(%arg0: i32) -> (i32, i32, i32) {
    %c0_i32 = arith.constant 0 : i32
    %c0_i32_0 = arith.constant 0 : i32
    %c0_i32_1 = arith.constant 0 : i32
    return %arg0, %c0_i32, %c0_i32_0 : i32, i32, i32
  }
  func.func @transform_1(%arg0: i32) -> (i32, i32) {
    %c0_i32 = arith.constant 0 : i32
    %c0_i32_0 = arith.constant 0 : i32
    %c0_i32_1 = arith.constant 0 : i32
    return %c0_i32, %c0_i32_0 : i32, i32
  }
  func.func @transform_2(%arg0: i32) -> (i32, i32) {
    %c0_i32 = arith.constant 0 : i32
    %c0_i32_0 = arith.constant 0 : i32
    %c0_i32_1 = arith.constant 0 : i32
    return %c0_i32, %c0_i32_0 : i32, i32
  }
  func.func @transform_3(%arg0: i32) -> (i32, i32, i32) {
    %c0_i32 = arith.constant 0 : i32
    %c0_i32_0 = arith.constant 0 : i32
    %c0_i32_1 = arith.constant 0 : i32
    %c0_i32_2 = arith.constant 0 : i32
    return %c0_i32, %c0_i32_0, %c0_i32_1 : i32, i32, i32
  }
  func.func @transform_4(%arg0: i32) -> (i32, i32) {
    %c0_i32 = arith.constant 0 : i32
    %c0_i32_0 = arith.constant 0 : i32
    %c0_i32_1 = arith.constant 0 : i32
    return %c0_i32, %c0_i32_0 : i32, i32
  }
  func.func @transform_5(%arg0: i32) -> (i32, i32) {
    %c0_i32 = arith.constant 0 : i32
    %c0_i32_0 = arith.constant 0 : i32
    %c0_i32_1 = arith.constant 0 : i32
    return %c0_i32, %c0_i32_0 : i32, i32
  }
  func.func @transform_6(%arg0: i32) -> (i32, i32) {
    %c0_i32 = arith.constant 0 : i32
    %c0_i32_0 = arith.constant 0 : i32
    %c0_i32_1 = arith.constant 0 : i32
    return %c0_i32, %c0_i32_0 : i32, i32
  }
  func.func @transform_7(%arg0: i32) -> (i32, i32) {
    %c0_i32 = arith.constant 0 : i32
    %c0_i32_0 = arith.constant 0 : i32
    return %arg0, %c0_i32 : i32, i32
  }
}

</mosaic_0001>

<bundles_post_ra>
// kernel: tpu_custom_call.1
= control target key start
LH: loop header
LB: loop body
LE: loop exit
PB: predicated region body
PF: predicated region fallthrough
CT: control target
= control target key end

     0   :  { %13 = vsyncpa [#allocation4], 0  ;;  %s961_s0 = inlined_call_operand.hbm [shape: bf16[2,16,128], index: 0, kind: input, shape index: {}]   ;;  %s962_s1 = inlined_call_operand.hbm [shape: bf16[128,256], index: 1, kind: input, shape index: {}]   ;;  %s963_s2 = inlined_call_operand.vmem [shape: f32[1,256], index: 2, kind: input, shape index: {}]   ;;  %s964_s3 = inlined_call_operand.hbm [shape: bf16[1,256,256], index: 3, kind: input, shape index: {}]   ;;  %s965_s4 = inlined_call_operand.vmem [shape: f32[1,256], index: 4, kind: input, shape index: {}]   ;;  %s966_s5 = inlined_call_operand.vmem [shape: f32[1,128], index: 5, kind: input, shape index: {}]   ;;  %s967_s6 = inlined_call_operand.<no memory space> [shape: f32[1,1], index: 6, kind: input, shape index: {}]   ;;  %s968_s7 = inlined_call_operand.hbm [shape: f32[2,128], index: 7, kind: output, shape index: {}]  }
   0x1   :  { %14 = vsyncpa [#allocation7], 0 }
   0x2   :  { %15 = vsyncpa [#allocation5], 0  ;;  %s867_s24 = smov [#allocation6]  }
   0x3   :  { %s33_s25 = sshll.u32 %s867_s24, 4  ;;  %s34_s25 = int_to_ptr.vmem [resolvable:$true] %s33_s25 }
   0x4   :  { %s789_s26 = scalar_lea.vmem %s34_s25, 2048  ;;  %p794_p1 = scmp.lt.s32.totalorder %s34_s25, %s34_s25 }
   0x5   :  { %p790_p0 = scmp.ne.s32.totalorder %s34_s25, %s789_s26  ;;  %p795_p2 = scmp.lt.s32.totalorder %s789_s26, %s789_s26 }
   0x7   :  { %p796_p3 = por %p795_p2, %p794_p1 }
   0x9   :  { %p797_p4 = pnand %p796_p3, %p790_p0 }
   0xb   :  { %800 = shalt.err (!%p797_p4)
}
   0xc   :  { %s868_s27 = smov 128   ;;  %s869_s28 = smov 8  }
   0xd   :  { %39 = dma.hbm_to_vmem [thread:$0]  %s962_s1, 2048, %s34_s25, [#allocation7], %s868_s27, %s868_s27, %s869_s28  }
   0xe   :  { %s870_s8 = smov [#allocation3]  }
   0xf   :  { %s21_s9 = sshll.u32 %s870_s8, 4  ;;  %s22_s9 = int_to_ptr.vmem [resolvable:$true] %s21_s9 }
  0x10   :  { %s809_s10 = scalar_lea.vmem %s22_s9, 256  ;;  %p814_p6 = scmp.lt.s32.totalorder %s22_s9, %s22_s9 }
  0x11   :  { %p810_p5 = scmp.ne.s32.totalorder %s22_s9, %s809_s10  ;;  %p815_p7 = scmp.lt.s32.totalorder %s809_s10, %s809_s10 }
  0x13   :  { %p816_p8 = por %p815_p7, %p814_p6 }
  0x15   :  { %p817_p9 = pnand %p816_p8, %p810_p5 }
  0x17   :  { %820 = shalt.err (!%p817_p9)
}
  0x18   :  { %s871_s11 = smov 64   ;;  %s872_s12 = smov 4  }
  0x19   :  { %27 = dma.hbm_to_vmem [thread:$0]  %s961_s0, 256, %s22_s9, [#allocation4], %s871_s11, %s871_s11, %s872_s12  }
  0x1a   :  { %s873_s15 = smov [#allocation8]  }
  0x1b   :  { %s47_s16 = sshll.u32 %s873_s15, 4  ;;  %s48_s16 = int_to_ptr.vmem [resolvable:$true] %s47_s16 }
  0x1c   :  { %s829_s1 = scalar_lea.vmem %s48_s16, 4096  ;;  %p834_p11 = scmp.lt.s32.totalorder %s48_s16, %s48_s16 }
  0x1d   :  { %p830_p10 = scmp.ne.s32.totalorder %s48_s16, %s829_s1  ;;  %p835_p12 = scmp.lt.s32.totalorder %s829_s1, %s829_s1 }
  0x1f   :  { %p836_p13 = por %p835_p12, %p834_p11 }
  0x21   :  { %p837_p0 = pnand %p836_p13, %p830_p10 }
  0x23   :  { %840 = shalt.err (!%p837_p0)
}
  0x24   :  { %53 = dma.hbm_to_vmem [thread:$0]  %s964_s3, 4096, %s48_s16, [#allocation7], %s868_s27, %s868_s27, %s869_s28  }
  0x25   :  { %861 = dma.done.wait [#allocation4], 256  }
  0x26   :  { %862 = vsyncadd [#allocation4], 4294967040 }
  0x27   :  { %863 = dma.done.wait [#allocation7], 6144  }
  0x28   :  { %864 = vsyncadd [#allocation7], 4294961152  ;;  %v874_v0 = vmov 0   ;;  %v695_v1 = vld [vmem:[#allocation6 + $0x74] ss:$8 sps:$4 sm:$0xff]   ;;  %v92_v51 = vlaneseq  ;;  %vm615_vm0 = vcmask 1041409  }
  0x29   :  { %226 = vmatprep.mubr.bf16.mxu0 %v874_v0  ;;  %v697_v2 = vld [vmem:[#allocation6 + $0x70] ss:$8 sps:$4 sm:$0xff]   ;;  %194 = vmatprep.subr.bf16.mxu0 %v695_v1  ;;  %v698_v3 = vld [vmem:[#allocation6 + $0x64] ss:$8 sps:$4 sm:$0xff]   ;;  %v700_v4 = vld [vmem:[#allocation6 + $0x60] ss:$8 sps:$4 sm:$0xff]  }
  0x2a   :  { %195 = vmatpush1.bf16.msra.mxu0 %v697_v2  ;;  %v701_v5 = vld [vmem:[#allocation6 + $0x54] ss:$8 sps:$4 sm:$0xff]   ;;  %v703_v6 = vld [vmem:[#allocation6 + $0x50] ss:$8 sps:$4 sm:$0xff]   ;;  %v704_v7 = vld [vmem:[#allocation6 + $0x44] ss:$8 sps:$4 sm:$0xff]  }
  0x2b   :  { %196 = vmatprep.subr.bf16.mxu0 %v698_v3  ;;  %v706_v8 = vld [vmem:[#allocation6 + $0x40] ss:$8 sps:$4 sm:$0xff]   ;;  %v707_v9 = vld [vmem:[#allocation6 + $0x34] ss:$8 sps:$4 sm:$0xff]   ;;  %v723_v11 = vld [vmem:[#allocation8 + $0x70] ss:$8 sps:$4 sm:$0xff]  }
  0x2c   :  { %v721_v10 = vld [vmem:[#allocation8 + $0x74] ss:$8 sps:$4 sm:$0xff]   ;;  %v724_v12 = vld [vmem:[#allocation8 + $0x64] ss:$8 sps:$4 sm:$0xff]   ;;  %v709_v13 = vld [vmem:[#allocation6 + $0x30] ss:$8 sps:$4 sm:$0xff]  }
  0x2d   :  { %463 = vmatprep.subr.bf16.mxu1 %v721_v10  ;;  %v710_v14 = vld [vmem:[#allocation6 + $0x24] ss:$8 sps:$4 sm:$0xff]   ;;  %v726_v15 = vld [vmem:[#allocation8 + $0x60] ss:$8 sps:$4 sm:$0xff]   ;;  %v727_v16 = vld [vmem:[#allocation8 + $0x54] ss:$8 sps:$4 sm:$0xff]  }
  0x2e   :  { %197 = vmatpush1.bf16.msra.mxu0 %v700_v4  ;;  %464 = vmatpush1.bf16.msra.mxu1 %v723_v11  ;;  %v712_v17 = vld [vmem:[#allocation6 + $0x20] ss:$8 sps:$4 sm:$0xff]   ;;  %v713_v18 = vld [vmem:[#allocation6 + $0x14] ss:$8 sps:$4 sm:$0xff]   ;;  %v729_v19 = vld [vmem:[#allocation8 + $0x50] ss:$8 sps:$4 sm:$0xff]  }
  0x2f   :  { %198 = vmatprep.subr.bf16.mxu0 %v701_v5  ;;  %465 = vmatprep.subr.bf16.mxu1 %v724_v12  ;;  %v730_v20 = vld [vmem:[#allocation8 + $0x44] ss:$8 sps:$4 sm:$0xff]   ;;  %v715_v21 = vld [vmem:[#allocation6 + $0x10] ss:$8 sps:$4 sm:$0xff]   ;;  %v732_v23 = vld [vmem:[#allocation8 + $0x40] ss:$8 sps:$4 sm:$0xff]  }
  0x30   :  { %v716_v22 = vld [vmem:[#allocation6 + $0x4] ss:$8 sps:$4 sm:$0xff]   ;;  %v733_v24 = vld [vmem:[#allocation8 + $0x34] ss:$8 sps:$4 sm:$0xff]   ;;  %v718_v25 = vld [vmem:[#allocation6] ss:$8 sps:$4 sm:$0xff]  }
  0x31   :  { %v735_v26 = vld [vmem:[#allocation8 + $0x30] ss:$8 sps:$4 sm:$0xff]   ;;  %v736_v27 = vld [vmem:[#allocation8 + $0x24] ss:$8 sps:$4 sm:$0xff]   ;;  %v738_v29 = vld [vmem:[#allocation8 + $0x20] ss:$8 sps:$4 sm:$0xff]  }
  0x32   :  { %199 = vmatpush1.bf16.msra.mxu0 %v703_v6  ;;  %466 = vmatpush1.bf16.msra.mxu1 %v726_v15  ;;  %v719_v28 = vld [vmem:[#allocation3] sm:$0xff]   ;;  %v742_v32 = vld [vmem:[#allocation8 + $0x4] ss:$8 sps:$4 sm:$0xff]   ;;  %v720_v33 = vld [vmem:[#allocation3 + $0x8] sm:$0xff]   ;;  %v925_v52 = vshrl.u32 %v92_v51, 7 }
  0x33   :  { %200 = vmatprep.subr.bf16.mxu0 %v704_v7  ;;  %467 = vmatprep.subr.bf16.mxu1 %v727_v16  ;;  %v739_v30 = vld [vmem:[#allocation8 + $0x14] ss:$8 sps:$4 sm:$0xff]   ;;  %v741_v31 = vld [vmem:[#allocation8 + $0x10] ss:$8 sps:$4 sm:$0xff]   ;;  %v744_v34 = vld [vmem:[#allocation8] ss:$8 sps:$4 sm:$0xff]  }
  0x34   :  { %v745_v35 = vld [vmem:[#allocation8 + $0xf4] ss:$8 sps:$4 sm:$0xff]   ;;  %v747_v36 = vld [vmem:[#allocation8 + $0xf0] ss:$8 sps:$4 sm:$0xff]   ;;  %v748_v37 = vld [vmem:[#allocation8 + $0xe4] ss:$8 sps:$4 sm:$0xff]  }
  0x35   :  { %v750_v38 = vld [vmem:[#allocation8 + $0xe0] ss:$8 sps:$4 sm:$0xff]   ;;  %v751_v39 = vld [vmem:[#allocation8 + $0xd4] ss:$8 sps:$4 sm:$0xff]   ;;  %v753_v40 = vld [vmem:[#allocation8 + $0xd0] ss:$8 sps:$4 sm:$0xff]  }
  0x36   :  { %201 = vmatpush1.bf16.msra.mxu0 %v706_v8  ;;  %468 = vmatpush1.bf16.msra.mxu1 %v729_v19  ;;  %v754_v41 = vld [vmem:[#allocation8 + $0xc4] ss:$8 sps:$4 sm:$0xff]   ;;  %v756_v42 = vld [vmem:[#allocation8 + $0xc0] ss:$8 sps:$4 sm:$0xff]   ;;  %v757_v43 = vld [vmem:[#allocation8 + $0xb4] ss:$8 sps:$4 sm:$0xff]  }
  0x37   :  { %202 = vmatprep.subr.bf16.mxu0 %v707_v9  ;;  %469 = vmatprep.subr.bf16.mxu1 %v730_v20  ;;  %v759_v44 = vld [vmem:[#allocation8 + $0xb0] ss:$8 sps:$4 sm:$0xff]   ;;  %v760_v45 = vld [vmem:[#allocation8 + $0xa4] ss:$8 sps:$4 sm:$0xff]   ;;  %v762_v46 = vld [vmem:[#allocation8 + $0xa0] ss:$8 sps:$4 sm:$0xff]  }
  0x38   :  { %v763_v47 = vld [vmem:[#allocation8 + $0x94] ss:$8 sps:$4 sm:$0xff]   ;;  %v765_v48 = vld [vmem:[#allocation8 + $0x90] ss:$8 sps:$4 sm:$0xff]   ;;  %v766_v49 = vld [vmem:[#allocation8 + $0x84] ss:$8 sps:$4 sm:$0xff]  }
  0x39   :  { %v768_v50 = vld [vmem:[#allocation8 + $0x80] ss:$8 sps:$4 sm:$0xff]   ;;  %v98_v53 = vsub.s32 1, %v925_v52  ;;  %v94_v54 = vsub.s32 0, %v925_v52  ;;  %v90_v55 = vld [vmem:[%s963_s2] sm:$0x3] }
  0x3a   :  { %203 = vmatpush1.bf16.msra.mxu0 %v709_v13  ;;  %470 = vmatpush1.bf16.msra.mxu1 %v732_v23 }
  0x3b   :  { %204 = vmatprep.subr.bf16.mxu0 %v710_v14  ;;  %471 = vmatprep.subr.bf16.mxu1 %v733_v24  ;;  %v99_v57 = vrot.slane %v90_v55, %v98_v53  ;;  %v95_v58 = vrot.slane %v90_v55, %v94_v54 }
  0x3e   :  { %205 = vmatpush1.bf16.msra.mxu0 %v712_v17  ;;  %472 = vmatpush1.bf16.msra.mxu1 %v735_v26 }
  0x3f   :  { %206 = vmatprep.subr.bf16.mxu0 %v713_v18  ;;  %473 = vmatprep.subr.bf16.mxu1 %v736_v27  ;;  %v685_v27 = vld [vmem:[%s966_s5] ss:$0 sm:$0xff] }
  0x42   :  { %207 = vmatpush1.bf16.msra.mxu0 %v715_v21  ;;  %474 = vmatpush1.bf16.msra.mxu1 %v738_v29 }
  0x43   :  { %208 = vmatprep.subr.bf16.mxu0 %v716_v22  ;;  %475 = vmatprep.subr.bf16.mxu1 %v739_v30  ;;  %v937_v22 = vld [vmem:[%s965_s4] sm:$0x3] }
  0x44   :  { %v296_v23 = vrot.slane %v937_v22, %v94_v54 }
  0x46   :  { %209 = vmatpush1.bf16.msra.mxu0 %v718_v25  ;;  %476 = vmatpush1.bf16.msra.mxu1 %v741_v31 }
  0x47   :  { %477 = vmatprep.subr.bf16.mxu1 %v742_v32 }
  0x49   :  { %227 = vmatmul.mubr.bf16.vlgmr.msra.gmra.mxu0 %v719_v28 }
  0x4a   :  { %236 = vmatprep.mubr.bf16.mxu0 %v874_v0  ;;  %478 = vmatpush1.bf16.msra.mxu1 %v744_v34 }
  0x4b   :  { %479 = vmatprep.subr.bf16.mxu1 %v745_v35 }
  0x4e   :  { %480 = vmatpush2.bf16.msra.mxu1 %v747_v36 }
  0x4f   :  { %481 = vmatprep.subr.bf16.mxu1 %v748_v37 }
  0x51   :  { %237 = vmatmul.mubr.bf16.gmra.mxu0 %v720_v33 }
  0x52   :  { %482 = vmatpush2.bf16.msra.mxu1 %v750_v38 }
  0x53   :  { %483 = vmatprep.subr.bf16.mxu1 %v751_v39 }
  0x56   :  { %484 = vmatpush2.bf16.msra.mxu1 %v753_v40 }
  0x57   :  { %485 = vmatprep.subr.bf16.mxu1 %v754_v41 }
  0x5a   :  { %486 = vmatpush2.bf16.msra.mxu1 %v756_v42 }
  0x5b   :  { %487 = vmatprep.subr.bf16.mxu1 %v757_v43 }
  0x5e   :  { %488 = vmatpush2.bf16.msra.mxu1 %v759_v44 }
  0x5f   :  { %489 = vmatprep.subr.bf16.mxu1 %v760_v45  ;;  %v544_v45 = vstv %s967_s6  ;;  %s875_s6 = smov [#allocation9]  }
  0x60   :  { %s625_s22 = sshll.u32 %s875_s6, 4  ;;  %s626_s22 = int_to_ptr.vmem [resolvable:$true] %s625_s22 }
  0x61   :  { %s841_s23 = scalar_lea.vmem %s626_s22, 32  ;;  %p846_p2 = scmp.lt.s32.totalorder %s626_s22, %s626_s22 }
  0x62   :  { %490 = vmatpush2.bf16.msra.mxu1 %v762_v46  ;;  %p842_p1 = scmp.ne.s32.totalorder %s626_s22, %s841_s23  ;;  %p847_p3 = scmp.lt.s32.totalorder %s841_s23, %s841_s23 }
  0x63   :  { %491 = vmatprep.subr.bf16.mxu1 %v763_v47 }
  0x64   :  { %p848_p4 = por %p847_p3, %p846_p2 }
  0x66   :  { %492 = vmatpush2.bf16.msra.mxu1 %v765_v48  ;;  %p849_p5 = pnand %p848_p4, %p842_p1 }
  0x67   :  { %493 = vmatprep.subr.bf16.mxu1 %v766_v49 }
  0x6a   :  { %494 = vmatpush2.bf16.msra.mxu1 %v768_v50 }
 0x109   :  { %v228_v56 = vpop.f32.mrf.mxu0 }
 0x10a   :  { %v229_v63 = vadd.f32 %v228_v56, %v95_v58 }
 0x10b   :  { %v230_v59 = vpop.f32.mrf.mxu0 }
 0x10c   :  { %v231_v61 = vadd.f32 %v230_v59, %v99_v57  ;;  %v247_v6 = vmax.f32 %v229_v63, 0.0 }
 0x10d   :  { %v232_v60 = vpop.f32.mrf.mxu0 }
 0x10e   :  { %v233_v62 = vadd.f32 %v232_v60, %v95_v58  ;;  %v248_v4 = vmax.f32 %v231_v61, 0.0 }
 0x10f   :  { %v234_v0 = vpop.f32.mrf.mxu0 }
 0x110   :  { %v235_v1 = vadd.f32 %v234_v0, %v99_v57  ;;  %v249_v2 = vmax.f32 %v233_v62, 0.0 }
 0x111   :  { %v238_v3 = vpop.f32.mrf.mxu0 }
 0x112   :  { %v250_v5 = vmax.f32 %v235_v1, 0.0  ;;  %v255_v9 = vpack.c.bf16 %v249_v2, %v247_v6  ;;  %v239_v13 = vadd.f32 %v238_v3, %v95_v58 }
 0x113   :  { %v240_v7 = vpop.f32.mrf.mxu0 }
 0x114   :  { %v256_v8 = vpack.c.bf16 %v250_v5, %v248_v4  ;;  %v241_v11 = vadd.f32 %v240_v7, %v99_v57  ;;  %v251_v19 = vmax.f32 %v239_v13, 0.0 }
 0x115   :  { %v242_v10 = vpop.f32.mrf.mxu0 }
 0x116   :  { %v243_v12 = vadd.f32 %v242_v10, %v95_v58  ;;  %495 = vmatprep.mubr.bf16.mxu1 %v256_v8  ;;  %v252_v17 = vmax.f32 %v241_v11, 0.0 }
 0x117   :  { %v244_v14 = vpop.f32.mrf.mxu0  ;;  %496 = vmatmul.mubr.bf16.vlgmr.msra.gmra.mxu1 %v255_v9 }
 0x118   :  { %v245_v15 = vadd.f32 %v244_v14, %v99_v57  ;;  %v253_v16 = vmax.f32 %v243_v12, 0.0 }
 0x11a   :  { %v254_v18 = vmax.f32 %v245_v15, 0.0  ;;  %v257_v21 = vpack.c.bf16 %v253_v16, %v251_v19 }
 0x11c   :  { %v258_v20 = vpack.c.bf16 %v254_v18, %v252_v17 }
 0x11e   :  { %505 = vmatprep.mubr.bf16.mxu1 %v258_v20 }
 0x11f   :  { %506 = vmatmul.mubr.bf16.gmra.mxu1 %v257_v21 }
 0x1d7   :  { %v497_v24 = vpop.f32.mrf.mxu1 }
 0x1d8   :  { %v498_v25 = vadd.f32 %v497_v24, %v296_v23 }
 0x1d9   :  { %v940_v26 = vpop.f32.mrf.mxu1 }
 0x1da   :  { %v516_v28 = vmax.f32 %v498_v25, 0.0 }
 0x1db   :  { %v501_v29 = vpop.f32.mrf.mxu1 }
 0x1dc   :  { %v502_v30 = vadd.f32 %v501_v29, %v296_v23  ;;  %v531_v31 = vmul.f32 %v685_v27, %v516_v28 }
 0x1dd   :  { %v945_v32 = vpop.f32.mrf.mxu1 }
 0x1de   :  { %v518_v33 = vmax.f32 %v502_v30, 0.0  ;;  %535 = vadd.xlane.f32.xlu0 %v531_v31 }
 0x1df   :  { %v507_v34 = vpop.f32.mrf.mxu1 }
 0x1e0   :  { %v508_v35 = vadd.f32 %v507_v34, %v296_v23  ;;  %v532_v36 = vmul.f32 %v685_v27, %v518_v33  ;;  %v300_v33 = vrot.slane %v937_v22, %v98_v53 }
 0x1e1   :  { %v947_v37 = vpop.f32.mrf.mxu1 }
 0x1e2   :  { %v520_v38 = vmax.f32 %v508_v35, 0.0  ;;  %537 = vadd.xlane.f32.xlu0 %v532_v36  ;;  %v500_v35 = vadd.f32 %v940_v26, %v300_v33  ;;  %v504_v36 = vadd.f32 %v945_v32, %v300_v33 }
 0x1e3   :  { %v511_v39 = vpop.f32.mrf.mxu1 }
 0x1e4   :  { %v512_v40 = vadd.f32 %v511_v39, %v296_v23  ;;  %v533_v41 = vmul.f32 %v685_v27, %v520_v38  ;;  %v517_v39 = vmax.f32 %v500_v35, 0.0 }
 0x1e6   :  { %v522_v42 = vmax.f32 %v512_v40, 0.0  ;;  %539 = vadd.xlane.f32.xlu1 %v533_v41  ;;  %v519_v40 = vmax.f32 %v504_v36, 0.0 }
 0x1e8   :  { %v534_v43 = vmul.f32 %v685_v27, %v522_v42 }
 0x1ea   :  { %541 = vadd.xlane.f32.xlu1 %v534_v43  ;;  %v513_v43 = vpop.f32.mrf.mxu1 }
 0x267   :  { %v536_v44 = vpop.xlane.xlu0 %535 }
 0x268   :  { %v545_v47 = vadd.f32 %v544_v45, %v536_v44 }
 0x26b   :  { %v538_v46 = vpop.xlane.xlu0 %537 }
 0x26c   :  { %v546_v48 = vadd.f32 %v544_v45, %v538_v46  ;;  %v510_v46 = vadd.f32 %v947_v37, %v300_v33 }
 0x26e   :  { %v549_v49 = vmax.f32 %v545_v47, %v546_v48  ;;  %v521_v22 = vmax.f32 %v510_v46, 0.0 }
 0x26f   :  { %v540_v50 = vpop.xlane.xlu1 %539 }
 0x270   :  { %v550_v51 = vrot.slane %v549_v49, 4  ;;  %v547_v57 = vadd.f32 %v544_v45, %v540_v50 }
 0x272   :  { %v551_v54 = vmax.f32 %v549_v49, %v550_v51 }
 0x273   :  { %v542_v55 = vpop.xlane.xlu1 %541 }
 0x274   :  { %v552_v56 = vrot.slane %v551_v54, 2  ;;  %v548_v58 = vadd.f32 %v544_v45, %v542_v55 }
 0x276   :  { %v553_v59 = vmax.f32 %v551_v54, %v552_v56  ;;  %v556_v60 = vmax.f32 %v547_v57, %v548_v58 }
 0x278   :  { %v554_v61 = vrot.slane %v553_v59, 1  ;;  %v557_v62 = vrot.slane %v556_v60, 4 }
 0x27a   :  { %v555_v63 = vmax.f32 %v553_v59, %v554_v61  ;;  %v558_v0 = vmax.f32 %v556_v60, %v557_v62 }
 0x27c   :  { %v563_v1 = vsub.f32 %v545_v47, %v555_v63  ;;  %v564_v2 = vsub.f32 %v546_v48, %v555_v63  ;;  %v559_v3 = vrot.slane %v558_v0, 2  ;;  %v514_v47 = vadd.f32 %v513_v43, %v300_v33 }
 0x27e   :  { %v567_v4 = vmul.f32 1.442695, %v563_v1  ;;  %v569_v5 = vmul.f32 1.442695, %v564_v2  ;;  %v560_v6 = vmax.f32 %v558_v0, %v559_v3  ;;  %v523_v49 = vmax.f32 %v514_v47, 0.0 }
 0x280   :  { %769 = vpow2.f32 %v567_v4  ;;  %v561_v7 = vrot.slane %v560_v6, 1 }
 0x281   :  { %771 = vpow2.f32 %v569_v5 }
 0x282   :  { %v562_v8 = vmax.f32 %v560_v6, %v561_v7 }
 0x284   :  { %v565_v9 = vsub.f32 %v547_v57, %v562_v8  ;;  %v566_v10 = vsub.f32 %v548_v58, %v562_v8 }
 0x286   :  { %v571_v11 = vmul.f32 1.442695, %v565_v9  ;;  %v573_v12 = vmul.f32 1.442695, %v566_v10 }
 0x288   :  { %773 = vpow2.f32 %v571_v11 }
 0x289   :  { %775 = vpow2.f32 %v573_v12 }
 0x28d   :  { %v770_v13 = vpop.eup %769 }
 0x28e   :  { %v772_v14 = vpop.eup %771 }
 0x28f   :  { %v575_v15 = vadd.f32 %v772_v14, %v770_v13 }
 0x291   :  { %v576_v16 = vrot.slane %v575_v15, 4 }
 0x293   :  { %v577_v17 = vadd.f32 %v576_v16, %v575_v15 }
 0x295   :  { %v774_v18 = vpop.eup %773  ;;  %v578_v19 = vrot.slane %v577_v17, 2 }
 0x296   :  { %v776_v20 = vpop.eup %775 }
 0x297   :  { %v579_v21 = vadd.f32 %v578_v19, %v577_v17  ;;  %v582_v23 = vadd.f32 %v776_v20, %v774_v18 }
 0x299   :  { %v580_v24 = vrot.slane %v579_v21, 1  ;;  %v583_v25 = vrot.slane %v582_v23, 4 }
 0x29b   :  { %v581_v27 = vadd.f32 %v580_v24, %v579_v21  ;;  %v584_v28 = vadd.f32 %v583_v25, %v582_v23 }
 0x29d   :  { %777 = vrcp.f32 %v581_v27  ;;  %v585_v29 = vrot.slane %v584_v28, 2 }
 0x29f   :  { %v586_v30 = vadd.f32 %v585_v29, %v584_v28 }
 0x2a1   :  { %v587_v31 = vrot.slane %v586_v30, 1 }
 0x2a3   :  { %v588_v34 = vadd.f32 %v587_v31, %v586_v30 }
 0x2a5   :  { %779 = vrcp.f32 %v588_v34 }
 0x2aa   :  { %v778_v38 = vpop.eup %777 }
 0x2ab   :  { %v591_v41 = vmul.f32 %v778_v38, %v770_v13  ;;  %v592_v42 = vmul.f32 %v778_v38, %v772_v14 }
 0x2ad   :  { %v595_v44 = vmul.f32 %v591_v41, %v517_v39  ;;  %v596_v45 = vmul.f32 %v592_v42, %v519_v40 }
 0x2af   :  { %v599_v52 = vadd.f32 %v596_v45, %v595_v44 }
 0x2b1   :  { %v600_v48 = vrot.slane %v599_v52, 4 }
 0x2b2   :  { %v780_v53 = vpop.eup %779 }
 0x2b3   :  { %v593_v50 = vmul.f32 %v780_v53, %v774_v18  ;;  %v594_v26 = vmul.f32 %v780_v53, %v776_v20  ;;  %v601_v51 = vadd.f32 %v600_v48, %v599_v52 }
 0x2b5   :  { %v597_v32 = vmul.f32 %v593_v50, %v521_v22  ;;  %v598_v54 = vmul.f32 %v594_v26, %v523_v49  ;;  %v602_v55 = vrot.slane %v601_v51, 2 }
 0x2b7   :  { %v606_v56 = vadd.f32 %v598_v54, %v597_v32  ;;  %v603_v58 = vadd.f32 %v602_v55, %v601_v51 }
 0x2b9   :  { %v607_v57 = vrot.slane %v606_v56, 4  ;;  %v604_v61 = vrot.slane %v603_v58, 1 }
 0x2bb   :  { %v608_v59 = vadd.f32 %v607_v57, %v606_v56  ;;  %v605_v63 = vadd.f32 %v604_v61, %v603_v58 }
 0x2bd   :  { %v609_v60 = vrot.slane %v608_v59, 2 }
 0x2bf   :  { %v610_v62 = vadd.f32 %v609_v60, %v608_v59 }
 0x2c1   :  { %v611_v37 = vrot.slane %v610_v62, 1 }
 0x2c3   :  { %v612_v0 = vadd.f32 %v611_v37, %v610_v62 }
 0x2c5   :  { %v616_v1 = vsel %vm615_vm0, %v612_v0, %v605_v63 }
 0x2c6   :  { %618 = vst [vmem:[#allocation9] sm:$0x3] %v616_v1 }
 0x2c7   :  { %852 = shalt.err (!%p849_p5)
}
 0x2c8   :  { %628 = dma.vmem_to_hbm [thread:$0]  %s626_s22, 32, %s968_s7, [#allocation5]  }
 0x2c9   :  { %865 = dma.done.wait [#allocation5], 32  }
 0x2ca   :  { %866 = vsyncadd [#allocation5], 4294967264 }
 0x2cb   :  { %632 = vsyncpa [#allocation4], 1 }
 0x2cc   :  { %633 = vsyncpa [#allocation7], 1 }
 0x2cd   :  { %634 = vsyncpa [#allocation5], 1 }

// kernel: tpu_custom_call.1
= control target key start
LH: loop header
LB: loop body
LE: loop exit
PB: predicated region body
PF: predicated region fallthrough
CT: control target
= control target key end

     0   :  { %13 = vsyncpa [#allocation4], 0  ;;  %s961_s0 = inlined_call_operand.hbm [shape: bf16[2,16,128], index: 0, kind: input, shape index: {}]   ;;  %s962_s1 = inlined_call_operand.hbm [shape: bf16[128,256], index: 1, kind: input, shape index: {}]   ;;  %s963_s2 = inlined_call_operand.vmem [shape: f32[1,256], index: 2, kind: input, shape index: {}]   ;;  %s964_s3 = inlined_call_operand.hbm [shape: bf16[1,256,256], index: 3, kind: input, shape index: {}]   ;;  %s965_s4 = inlined_call_operand.vmem [shape: f32[1,256], index: 4, kind: input, shape index: {}]   ;;  %s966_s5 = inlined_call_operand.vmem [shape: f32[1,128], index: 5, kind: input, shape index: {}]   ;;  %s967_s6 = inlined_call_operand.<no memory space> [shape: f32[1,1], index: 6, kind: input, shape index: {}]   ;;  %s968_s7 = inlined_call_operand.hbm [shape: f32[2,128], index: 7, kind: output, shape index: {}]  }
   0x1   :  { %14 = vsyncpa [#allocation7], 0 }
   0x2   :  { %15 = vsyncpa [#allocation5], 0  ;;  %s867_s24 = smov [#allocation6]  }
   0x3   :  { %s33_s25 = sshll.u32 %s867_s24, 4  ;;  %s34_s25 = int_to_ptr.vmem [resolvable:$true] %s33_s25 }
   0x4   :  { %s789_s26 = scalar_lea.vmem %s34_s25, 2048  ;;  %p794_p1 = scmp.lt.s32.totalorder %s34_s25, %s34_s25 }
   0x5   :  { %p790_p0 = scmp.ne.s32.totalorder %s34_s25, %s789_s26  ;;  %p795_p2 = scmp.lt.s32.totalorder %s789_s26, %s789_s26 }
   0x7   :  { %p796_p3 = por %p795_p2, %p794_p1 }
   0x9   :  { %p797_p4 = pnand %p796_p3, %p790_p0 }
   0xb   :  { %800 = shalt.err (!%p797_p4)
}
   0xc   :  { %s868_s27 = smov 128   ;;  %s869_s28 = smov 8  }
   0xd   :  { %39 = dma.hbm_to_vmem [thread:$0]  %s962_s1, 2048, %s34_s25, [#allocation7], %s868_s27, %s868_s27, %s869_s28  }
   0xe   :  { %s870_s8 = smov [#allocation3]  }
   0xf   :  { %s21_s9 = sshll.u32 %s870_s8, 4  ;;  %s22_s9 = int_to_ptr.vmem [resolvable:$true] %s21_s9 }
  0x10   :  { %s809_s10 = scalar_lea.vmem %s22_s9, 256  ;;  %p814_p6 = scmp.lt.s32.totalorder %s22_s9, %s22_s9 }
  0x11   :  { %p810_p5 = scmp.ne.s32.totalorder %s22_s9, %s809_s10  ;;  %p815_p7 = scmp.lt.s32.totalorder %s809_s10, %s809_s10 }
  0x13   :  { %p816_p8 = por %p815_p7, %p814_p6 }
  0x15   :  { %p817_p9 = pnand %p816_p8, %p810_p5 }
  0x17   :  { %820 = shalt.err (!%p817_p9)
}
  0x18   :  { %s871_s11 = smov 64   ;;  %s872_s12 = smov 4  }
  0x19   :  { %27 = dma.hbm_to_vmem [thread:$0]  %s961_s0, 256, %s22_s9, [#allocation4], %s871_s11, %s871_s11, %s872_s12  }
  0x1a   :  { %s873_s15 = smov [#allocation8]  }
  0x1b   :  { %s47_s16 = sshll.u32 %s873_s15, 4  ;;  %s48_s16 = int_to_ptr.vmem [resolvable:$true] %s47_s16 }
  0x1c   :  { %s829_s1 = scalar_lea.vmem %s48_s16, 4096  ;;  %p834_p11 = scmp.lt.s32.totalorder %s48_s16, %s48_s16 }
  0x1d   :  { %p830_p10 = scmp.ne.s32.totalorder %s48_s16, %s829_s1  ;;  %p835_p12 = scmp.lt.s32.totalorder %s829_s1, %s829_s1 }
  0x1f   :  { %p836_p13 = por %p835_p12, %p834_p11 }
  0x21   :  { %p837_p0 = pnand %p836_p13, %p830_p10 }
  0x23   :  { %840 = shalt.err (!%p837_p0)
}
  0x24   :  { %53 = dma.hbm_to_vmem [thread:$0]  %s964_s3, 4096, %s48_s16, [#allocation7], %s868_s27, %s868_s27, %s869_s28  }
  0x25   :  { %861 = dma.done.wait [#allocation4], 256  }
  0x26   :  { %862 = vsyncadd [#allocation4], 4294967040 }
  0x27   :  { %863 = dma.done.wait [#allocation7], 6144  }
  0x28   :  { %864 = vsyncadd [#allocation7], 4294961152  ;;  %v874_v0 = vmov 0   ;;  %v695_v1 = vld [vmem:[#allocation6 + $0x74] ss:$8 sps:$4 sm:$0xff]   ;;  %v92_v51 = vlaneseq  ;;  %vm615_vm0 = vcmask 1041409  }
  0x29   :  { %226 = vmatprep.mubr.bf16.mxu0 %v874_v0  ;;  %v697_v2 = vld [vmem:[#allocation6 + $0x70] ss:$8 sps:$4 sm:$0xff]   ;;  %194 = vmatprep.subr.bf16.mxu0 %v695_v1  ;;  %v698_v3 = vld [vmem:[#allocation6 + $0x64] ss:$8 sps:$4 sm:$0xff]   ;;  %v700_v4 = vld [vmem:[#allocation6 + $0x60] ss:$8 sps:$4 sm:$0xff]  }
  0x2a   :  { %195 = vmatpush1.bf16.msra.mxu0 %v697_v2  ;;  %v701_v5 = vld [vmem:[#allocation6 + $0x54] ss:$8 sps:$4 sm:$0xff]   ;;  %v703_v6 = vld [vmem:[#allocation6 + $0x50] ss:$8 sps:$4 sm:$0xff]   ;;  %v704_v7 = vld [vmem:[#allocation6 + $0x44] ss:$8 sps:$4 sm:$0xff]  }
  0x2b   :  { %196 = vmatprep.subr.bf16.mxu0 %v698_v3  ;;  %v706_v8 = vld [vmem:[#allocation6 + $0x40] ss:$8 sps:$4 sm:$0xff]   ;;  %v707_v9 = vld [vmem:[#allocation6 + $0x34] ss:$8 sps:$4 sm:$0xff]   ;;  %v723_v11 = vld [vmem:[#allocation8 + $0x70] ss:$8 sps:$4 sm:$0xff]  }
  0x2c   :  { %v721_v10 = vld [vmem:[#allocation8 + $0x74] ss:$8 sps:$4 sm:$0xff]   ;;  %v724_v12 = vld [vmem:[#allocation8 + $0x64] ss:$8 sps:$4 sm:$0xff]   ;;  %v709_v13 = vld [vmem:[#allocation6 + $0x30] ss:$8 sps:$4 sm:$0xff]  }
  0x2d   :  { %463 = vmatprep.subr.bf16.mxu1 %v721_v10  ;;  %v710_v14 = vld [vmem:[#allocation6 + $0x24] ss:$8 sps:$4 sm:$0xff]   ;;  %v726_v15 = vld [vmem:[#allocation8 + $0x60] ss:$8 sps:$4 sm:$0xff]   ;;  %v727_v16 = vld [vmem:[#allocation8 + $0x54] ss:$8 sps:$4 sm:$0xff]  }
  0x2e   :  { %197 = vmatpush1.bf16.msra.mxu0 %v700_v4  ;;  %464 = vmatpush1.bf16.msra.mxu1 %v723_v11  ;;  %v712_v17 = vld [vmem:[#allocation6 + $0x20] ss:$8 sps:$4 sm:$0xff]   ;;  %v713_v18 = vld [vmem:[#allocation6 + $0x14] ss:$8 sps:$4 sm:$0xff]   ;;  %v729_v19 = vld [vmem:[#allocation8 + $0x50] ss:$8 sps:$4 sm:$0xff]  }
  0x2f   :  { %198 = vmatprep.subr.bf16.mxu0 %v701_v5  ;;  %465 = vmatprep.subr.bf16.mxu1 %v724_v12  ;;  %v730_v20 = vld [vmem:[#allocation8 + $0x44] ss:$8 sps:$4 sm:$0xff]   ;;  %v715_v21 = vld [vmem:[#allocation6 + $0x10] ss:$8 sps:$4 sm:$0xff]   ;;  %v732_v23 = vld [vmem:[#allocation8 + $0x40] ss:$8 sps:$4 sm:$0xff]  }
  0x30   :  { %v716_v22 = vld [vmem:[#allocation6 + $0x4] ss:$8 sps:$4 sm:$0xff]   ;;  %v733_v24 = vld [vmem:[#allocation8 + $0x34] ss:$8 sps:$4 sm:$0xff]   ;;  %v718_v25 = vld [vmem:[#allocation6] ss:$8 sps:$4 sm:$0xff]  }
  0x31   :  { %v735_v26 = vld [vmem:[#allocation8 + $0x30] ss:$8 sps:$4 sm:$0xff]   ;;  %v736_v27 = vld [vmem:[#allocation8 + $0x24] ss:$8 sps:$4 sm:$0xff]   ;;  %v738_v29 = vld [vmem:[#allocation8 + $0x20] ss:$8 sps:$4 sm:$0xff]  }
  0x32   :  { %199 = vmatpush1.bf16.msra.mxu0 %v703_v6  ;;  %466 = vmatpush1.bf16.msra.mxu1 %v726_v15  ;;  %v719_v28 = vld [vmem:[#allocation3] sm:$0xff]   ;;  %v742_v32 = vld [vmem:[#allocation8 + $0x4] ss:$8 sps:$4 sm:$0xff]   ;;  %v720_v33 = vld [vmem:[#allocation3 + $0x8] sm:$0xff]   ;;  %v925_v52 = vshrl.u32 %v92_v51, 7 }
  0x33   :  { %200 = vmatprep.subr.bf16.mxu0 %v704_v7  ;;  %467 = vmatprep.subr.bf16.mxu1 %v727_v16  ;;  %v739_v30 = vld [vmem:[#allocation8 + $0x14] ss:$8 sps:$4 sm:$0xff]   ;;  %v741_v31 = vld [vmem:[#allocation8 + $0x10] ss:$8 sps:$4 sm:$0xff]   ;;  %v744_v34 = vld [vmem:[#allocation8] ss:$8 sps:$4 sm:$0xff]  }
  0x34   :  { %v745_v35 = vld [vmem:[#allocation8 + $0xf4] ss:$8 sps:$4 sm:$0xff]   ;;  %v747_v36 = vld [vmem:[#allocation8 + $0xf0] ss:$8 sps:$4 sm:$0xff]   ;;  %v748_v37 = vld [vmem:[#allocation8 + $0xe4] ss:$8 sps:$4 sm:$0xff]  }
  0x35   :  { %v750_v38 = vld [vmem:[#allocation8 + $0xe0] ss:$8 sps:$4 sm:$0xff]   ;;  %v751_v39 = vld [vmem:[#allocation8 + $0xd4] ss:$8 sps:$4 sm:$0xff]   ;;  %v753_v40 = vld [vmem:[#allocation8 + $0xd0] ss:$8 sps:$4 sm:$0xff]  }
  0x36   :  { %201 = vmatpush1.bf16.msra.mxu0 %v706_v8  ;;  %468 = vmatpush1.bf16.msra.mxu1 %v729_v19  ;;  %v754_v41 = vld [vmem:[#allocation8 + $0xc4] ss:$8 sps:$4 sm:$0xff]   ;;  %v756_v42 = vld [vmem:[#allocation8 + $0xc0] ss:$8 sps:$4 sm:$0xff]   ;;  %v757_v43 = vld [vmem:[#allocation8 + $0xb4] ss:$8 sps:$4 sm:$0xff]  }
  0x37   :  { %202 = vmatprep.subr.bf16.mxu0 %v707_v9  ;;  %469 = vmatprep.subr.bf16.mxu1 %v730_v20  ;;  %v759_v44 = vld [vmem:[#allocation8 + $0xb0] ss:$8 sps:$4 sm:$0xff]   ;;  %v760_v45 = vld [vmem:[#allocation8 + $0xa4] ss:$8 sps:$4 sm:$0xff]   ;;  %v762_v46 = vld [vmem:[#allocation8 + $0xa0] ss:$8 sps:$4 sm:$0xff]  }
  0x38   :  { %v763_v47 = vld [vmem:[#allocation8 + $0x94] ss:$8 sps:$4 sm:$0xff]   ;;  %v765_v48 = vld [vmem:[#allocation8 + $0x90] ss:$8 sps:$4 sm:$0xff]   ;;  %v766_v49 = vld [vmem:[#allocation8 + $0x84] ss:$8 sps:$4 sm:$0xff]  }
  0x39   :  { %v768_v50 = vld [vmem:[#allocation8 + $0x80] ss:$8 sps:$4 sm:$0xff]   ;;  %v98_v53 = vsub.s32 1, %v925_v52  ;;  %v94_v54 = vsub.s32 0, %v925_v52  ;;  %v90_v55 = vld [vmem:[%s963_s2] sm:$0x3] }
  0x3a   :  { %203 = vmatpush1.bf16.msra.mxu0 %v709_v13  ;;  %470 = vmatpush1.bf16.msra.mxu1 %v732_v23 }
  0x3b   :  { %204 = vmatprep.subr.bf16.mxu0 %v710_v14  ;;  %471 = vmatprep.subr.bf16.mxu1 %v733_v24  ;;  %v99_v57 = vrot.slane %v90_v55, %v98_v53  ;;  %v95_v58 = vrot.slane %v90_v55, %v94_v54 }
  0x3e   :  { %205 = vmatpush1.bf16.msra.mxu0 %v712_v17  ;;  %472 = vmatpush1.bf16.msra.mxu1 %v735_v26 }
  0x3f   :  { %206 = vmatprep.subr.bf16.mxu0 %v713_v18  ;;  %473 = vmatprep.subr.bf16.mxu1 %v736_v27  ;;  %v685_v27 = vld [vmem:[%s966_s5] ss:$0 sm:$0xff] }
  0x42   :  { %207 = vmatpush1.bf16.msra.mxu0 %v715_v21  ;;  %474 = vmatpush1.bf16.msra.mxu1 %v738_v29 }
  0x43   :  { %208 = vmatprep.subr.bf16.mxu0 %v716_v22  ;;  %475 = vmatprep.subr.bf16.mxu1 %v739_v30  ;;  %v937_v22 = vld [vmem:[%s965_s4] sm:$0x3] }
  0x44   :  { %v296_v23 = vrot.slane %v937_v22, %v94_v54 }
  0x46   :  { %209 = vmatpush1.bf16.msra.mxu0 %v718_v25  ;;  %476 = vmatpush1.bf16.msra.mxu1 %v741_v31 }
  0x47   :  { %477 = vmatprep.subr.bf16.mxu1 %v742_v32 }
  0x49   :  { %227 = vmatmul.mubr.bf16.vlgmr.msra.gmra.mxu0 %v719_v28 }
  0x4a   :  { %236 = vmatprep.mubr.bf16.mxu0 %v874_v0  ;;  %478 = vmatpush1.bf16.msra.mxu1 %v744_v34 }
  0x4b   :  { %479 = vmatprep.subr.bf16.mxu1 %v745_v35 }
  0x4e   :  { %480 = vmatpush2.bf16.msra.mxu1 %v747_v36 }
  0x4f   :  { %481 = vmatprep.subr.bf16.mxu1 %v748_v37 }
  0x51   :  { %237 = vmatmul.mubr.bf16.gmra.mxu0 %v720_v33 }
  0x52   :  { %482 = vmatpush2.bf16.msra.mxu1 %v750_v38 }
  0x53   :  { %483 = vmatprep.subr.bf16.mxu1 %v751_v39 }
  0x56   :  { %484 = vmatpush2.bf16.msra.mxu1 %v753_v40 }
  0x57   :  { %485 = vmatprep.subr.bf16.mxu1 %v754_v41 }
  0x5a   :  { %486 = vmatpush2.bf16.msra.mxu1 %v756_v42 }
  0x5b   :  { %487 = vmatprep.subr.bf16.mxu1 %v757_v43 }
  0x5e   :  { %488 = vmatpush2.bf16.msra.mxu1 %v759_v44 }
  0x5f   :  { %489 = vmatprep.subr.bf16.mxu1 %v760_v45  ;;  %v544_v45 = vstv %s967_s6  ;;  %s875_s6 = smov [#allocation9]  }
  0x60   :  { %s625_s22 = sshll.u32 %s875_s6, 4  ;;  %s626_s22 = int_to_ptr.vmem [resolvable:$true] %s625_s22 }
  0x61   :  { %s841_s23 = scalar_lea.vmem %s626_s22, 32  ;;  %p846_p2 = scmp.lt.s32.totalorder %s626_s22, %s626_s22 }
  0x62   :  { %490 = vmatpush2.bf16.msra.mxu1 %v762_v46  ;;  %p842_p1 = scmp.ne.s32.totalorder %s626_s22, %s841_s23  ;;  %p847_p3 = scmp.lt.s32.totalorder %s841_s23, %s841_s23 }
  0x63   :  { %491 = vmatprep.subr.bf16.mxu1 %v763_v47 }
  0x64   :  { %p848_p4 = por %p847_p3, %p846_p2 }
  0x66   :  { %492 = vmatpush2.bf16.msra.mxu1 %v765_v48  ;;  %p849_p5 = pnand %p848_p4, %p842_p1 }
  0x67   :  { %493 = vmatprep.subr.bf16.mxu1 %v766_v49 }
  0x6a   :  { %494 = vmatpush2.bf16.msra.mxu1 %v768_v50 }
 0x109   :  { %v228_v56 = vpop.f32.mrf.mxu0 }
 0x10a   :  { %v229_v63 = vadd.f32 %v228_v56, %v95_v58 }
 0x10b   :  { %v230_v59 = vpop.f32.mrf.mxu0 }
 0x10c   :  { %v231_v61 = vadd.f32 %v230_v59, %v99_v57  ;;  %v247_v6 = vmax.f32 %v229_v63, 0.0 }
 0x10d   :  { %v232_v60 = vpop.f32.mrf.mxu0 }
 0x10e   :  { %v233_v62 = vadd.f32 %v232_v60, %v95_v58  ;;  %v248_v4 = vmax.f32 %v231_v61, 0.0 }
 0x10f   :  { %v234_v0 = vpop.f32.mrf.mxu0 }
 0x110   :  { %v235_v1 = vadd.f32 %v234_v0, %v99_v57  ;;  %v249_v2 = vmax.f32 %v233_v62, 0.0 }
 0x111   :  { %v238_v3 = vpop.f32.mrf.mxu0 }
 0x112   :  { %v250_v5 = vmax.f32 %v235_v1, 0.0  ;;  %v255_v9 = vpack.c.bf16 %v249_v2, %v247_v6  ;;  %v239_v13 = vadd.f32 %v238_v3, %v95_v58 }
 0x113   :  { %v240_v7 = vpop.f32.mrf.mxu0 }
 0x114   :  { %v256_v8 = vpack.c.bf16 %v250_v5, %v248_v4  ;;  %v241_v11 = vadd.f32 %v240_v7, %v99_v57  ;;  %v251_v19 = vmax.f32 %v239_v13, 0.0 }
 0x115   :  { %v242_v10 = vpop.f32.mrf.mxu0 }
 0x116   :  { %v243_v12 = vadd.f32 %v242_v10, %v95_v58  ;;  %495 = vmatprep.mubr.bf16.mxu1 %v256_v8  ;;  %v252_v17 = vmax.f32 %v241_v11, 0.0 }
 0x117   :  { %v244_v14 = vpop.f32.mrf.mxu0  ;;  %496 = vmatmul.mubr.bf16.vlgmr.msra.gmra.mxu1 %v255_v9 }
 0x118   :  { %v245_v15 = vadd.f32 %v244_v14, %v99_v57  ;;  %v253_v16 = vmax.f32 %v243_v12, 0.0 }
 0x11a   :  { %v254_v18 = vmax.f32 %v245_v15, 0.0  ;;  %v257_v21 = vpack.c.bf16 %v253_v16, %v251_v19 }
 0x11c   :  { %v258_v20 = vpack.c.bf16 %v254_v18, %v252_v17 }
 0x11e   :  { %505 = vmatprep.mubr.bf16.mxu1 %v258_v20 }
 0x11f   :  { %506 = vmatmul.mubr.bf16.gmra.mxu1 %v257_v21 }
 0x1d7   :  { %v497_v24 = vpop.f32.mrf.mxu1 }
 0x1d8   :  { %v498_v25 = vadd.f32 %v497_v24, %v296_v23 }
 0x1d9   :  { %v940_v26 = vpop.f32.mrf.mxu1 }
 0x1da   :  { %v516_v28 = vmax.f32 %v498_v25, 0.0 }
 0x1db   :  { %v501_v29 = vpop.f32.mrf.mxu1 }
 0x1dc   :  { %v502_v30 = vadd.f32 %v501_v29, %v296_v23  ;;  %v531_v31 = vmul.f32 %v685_v27, %v516_v28 }
 0x1dd   :  { %v945_v32 = vpop.f32.mrf.mxu1 }
 0x1de   :  { %v518_v33 = vmax.f32 %v502_v30, 0.0  ;;  %535 = vadd.xlane.f32.xlu0 %v531_v31 }
 0x1df   :  { %v507_v34 = vpop.f32.mrf.mxu1 }
 0x1e0   :  { %v508_v35 = vadd.f32 %v507_v34, %v296_v23  ;;  %v532_v36 = vmul.f32 %v685_v27, %v518_v33  ;;  %v300_v33 = vrot.slane %v937_v22, %v98_v53 }
 0x1e1   :  { %v947_v37 = vpop.f32.mrf.mxu1 }
 0x1e2   :  { %v520_v38 = vmax.f32 %v508_v35, 0.0  ;;  %537 = vadd.xlane.f32.xlu0 %v532_v36  ;;  %v500_v35 = vadd.f32 %v940_v26, %v300_v33  ;;  %v504_v36 = vadd.f32 %v945_v32, %v300_v33 }
 0x1e3   :  { %v511_v39 = vpop.f32.mrf.mxu1 }
 0x1e4   :  { %v512_v40 = vadd.f32 %v511_v39, %v296_v23  ;;  %v533_v41 = vmul.f32 %v685_v27, %v520_v38  ;;  %v517_v39 = vmax.f32 %v500_v35, 0.0 }
 0x1e6   :  { %v522_v42 = vmax.f32 %v512_v40, 0.0  ;;  %539 = vadd.xlane.f32.xlu1 %v533_v41  ;;  %v519_v40 = vmax.f32 %v504_v36, 0.0 }
 0x1e8   :  { %v534_v43 = vmul.f32 %v685_v27, %v522_v42 }
 0x1ea   :  { %541 = vadd.xlane.f32.xlu1 %v534_v43  ;;  %v513_v43 = vpop.f32.mrf.mxu1 }
 0x267   :  { %v536_v44 = vpop.xlane.xlu0 %535 }
 0x268   :  { %v545_v47 = vadd.f32 %v544_v45, %v536_v44 }
 0x26b   :  { %v538_v46 = vpop.xlane.xlu0 %537 }
 0x26c   :  { %v546_v48 = vadd.f32 %v544_v45, %v538_v46  ;;  %v510_v46 = vadd.f32 %v947_v37, %v300_v33 }
 0x26e   :  { %v549_v49 = vmax.f32 %v545_v47, %v546_v48  ;;  %v521_v22 = vmax.f32 %v510_v46, 0.0 }
 0x26f   :  { %v540_v50 = vpop.xlane.xlu1 %539 }
 0x270   :  { %v550_v51 = vrot.slane %v549_v49, 4  ;;  %v547_v57 = vadd.f32 %v544_v45, %v540_v50 }
 0x272   :  { %v551_v54 = vmax.f32 %v549_v49, %v550_v51 }
 0x273   :  { %v542_v55 = vpop.xlane.xlu1 %541 }
 0x274   :  { %v552_v56 = vrot.slane %v551_v54, 2  ;;  %v548_v58 = vadd.f32 %v544_v45, %v542_v55 }
 0x276   :  { %v553_v59 = vmax.f32 %v551_v54, %v552_v56  ;;  %v556_v60 = vmax.f32 %v547_v57, %v548_v58 }
 0x278   :  { %v554_v61 = vrot.slane %v553_v59, 1  ;;  %v557_v62 = vrot.slane %v556_v60, 4 }
 0x27a   :  { %v555_v63 = vmax.f32 %v553_v59, %v554_v61  ;;  %v558_v0 = vmax.f32 %v556_v60, %v557_v62 }
 0x27c   :  { %v563_v1 = vsub.f32 %v545_v47, %v555_v63  ;;  %v564_v2 = vsub.f32 %v546_v48, %v555_v63  ;;  %v559_v3 = vrot.slane %v558_v0, 2  ;;  %v514_v47 = vadd.f32 %v513_v43, %v300_v33 }
 0x27e   :  { %v567_v4 = vmul.f32 1.442695, %v563_v1  ;;  %v569_v5 = vmul.f32 1.442695, %v564_v2  ;;  %v560_v6 = vmax.f32 %v558_v0, %v559_v3  ;;  %v523_v49 = vmax.f32 %v514_v47, 0.0 }
 0x280   :  { %769 = vpow2.f32 %v567_v4  ;;  %v561_v7 = vrot.slane %v560_v6, 1 }
 0x281   :  { %771 = vpow2.f32 %v569_v5 }
 0x282   :  { %v562_v8 = vmax.f32 %v560_v6, %v561_v7 }
 0x284   :  { %v565_v9 = vsub.f32 %v547_v57, %v562_v8  ;;  %v566_v10 = vsub.f32 %v548_v58, %v562_v8 }
 0x286   :  { %v571_v11 = vmul.f32 1.442695, %v565_v9  ;;  %v573_v12 = vmul.f32 1.442695, %v566_v10 }
 0x288   :  { %773 = vpow2.f32 %v571_v11 }
 0x289   :  { %775 = vpow2.f32 %v573_v12 }
 0x28d   :  { %v770_v13 = vpop.eup %769 }
 0x28e   :  { %v772_v14 = vpop.eup %771 }
 0x28f   :  { %v575_v15 = vadd.f32 %v772_v14, %v770_v13 }
 0x291   :  { %v576_v16 = vrot.slane %v575_v15, 4 }
 0x293   :  { %v577_v17 = vadd.f32 %v576_v16, %v575_v15 }
 0x295   :  { %v774_v18 = vpop.eup %773  ;;  %v578_v19 = vrot.slane %v577_v17, 2 }
 0x296   :  { %v776_v20 = vpop.eup %775 }
 0x297   :  { %v579_v21 = vadd.f32 %v578_v19, %v577_v17  ;;  %v582_v23 = vadd.f32 %v776_v20, %v774_v18 }
 0x299   :  { %v580_v24 = vrot.slane %v579_v21, 1  ;;  %v583_v25 = vrot.slane %v582_v23, 4 }
 0x29b   :  { %v581_v27 = vadd.f32 %v580_v24, %v579_v21  ;;  %v584_v28 = vadd.f32 %v583_v25, %v582_v23 }
 0x29d   :  { %777 = vrcp.f32 %v581_v27  ;;  %v585_v29 = vrot.slane %v584_v28, 2 }
 0x29f   :  { %v586_v30 = vadd.f32 %v585_v29, %v584_v28 }
 0x2a1   :  { %v587_v31 = vrot.slane %v586_v30, 1 }
 0x2a3   :  { %v588_v34 = vadd.f32 %v587_v31, %v586_v30 }
 0x2a5   :  { %779 = vrcp.f32 %v588_v34 }
 0x2aa   :  { %v778_v38 = vpop.eup %777 }
 0x2ab   :  { %v591_v41 = vmul.f32 %v778_v38, %v770_v13  ;;  %v592_v42 = vmul.f32 %v778_v38, %v772_v14 }
 0x2ad   :  { %v595_v44 = vmul.f32 %v591_v41, %v517_v39  ;;  %v596_v45 = vmul.f32 %v592_v42, %v519_v40 }
 0x2af   :  { %v599_v52 = vadd.f32 %v596_v45, %v595_v44 }
 0x2b1   :  { %v600_v48 = vrot.slane %v599_v52, 4 }
 0x2b2   :  { %v780_v53 = vpop.eup %779 }
 0x2b3   :  { %v593_v50 = vmul.f32 %v780_v53, %v774_v18  ;;  %v594_v26 = vmul.f32 %v780_v53, %v776_v20  ;;  %v601_v51 = vadd.f32 %v600_v48, %v599_v52 }
 0x2b5   :  { %v597_v32 = vmul.f32 %v593_v50, %v521_v22  ;;  %v598_v54 = vmul.f32 %v594_v26, %v523_v49  ;;  %v602_v55 = vrot.slane %v601_v51, 2 }
 0x2b7   :  { %v606_v56 = vadd.f32 %v598_v54, %v597_v32  ;;  %v603_v58 = vadd.f32 %v602_v55, %v601_v51 }
 0x2b9   :  { %v607_v57 = vrot.slane %v606_v56, 4  ;;  %v604_v61 = vrot.slane %v603_v58, 1 }
 0x2bb   :  { %v608_v59 = vadd.f32 %v607_v57, %v606_v56  ;;  %v605_v63 = vadd.f32 %v604_v61, %v603_v58 }
 0x2bd   :  { %v609_v60 = vrot.slane %v608_v59, 2 }
 0x2bf   :  { %v610_v62 = vadd.f32 %v609_v60, %v608_v59 }
 0x2c1   :  { %v611_v37 = vrot.slane %v610_v62, 1 }
 0x2c3   :  { %v612_v0 = vadd.f32 %v611_v37, %v610_v62 }
 0x2c5   :  { %v616_v1 = vsel %vm615_vm0, %v612_v0, %v605_v63 }
 0x2c6   :  { %618 = vst [vmem:[#allocation9] sm:$0x3] %v616_v1 }
 0x2c7   :  { %852 = shalt.err (!%p849_p5)
}
 0x2c8   :  { %628 = dma.vmem_to_hbm [thread:$0]  %s626_s22, 32, %s968_s7, [#allocation5]  }
 0x2c9   :  { %865 = dma.done.wait [#allocation5], 32  }
 0x2ca   :  { %866 = vsyncadd [#allocation5], 4294967264 }
 0x2cb   :  { %632 = vsyncpa [#allocation4], 1 }
 0x2cc   :  { %633 = vsyncpa [#allocation7], 1 }
 0x2cd   :  { %634 = vsyncpa [#allocation5], 1 }

</bundles_post_ra>
